<compile_context>
chip_gen: v6e
topology: v6e:2x2x1
jax: 0.10.0
libtpu: 0.0.40
codegen_flags: <defaults>
</compile_context>

<pallas_src>
import functools

import jax
import jax.numpy as jnp
from jax import lax
from jax.experimental import pallas as pl
from jax.experimental.pallas import tpu as pltpu


def _round_up(x, m):
    return (x + m - 1) // m * m


def _vmem_limit_bytes(need_bytes):
    """Advisory scoped-VMEM limit: 2x estimated need, min 16 MiB, capped at
    ~3/4 of physical VMEM (≈48 MiB on v7x, ≈96 MiB on v5e/v6e)."""
    cap = 64 * 1024 * 1024
    try:
        cap = int(pltpu.get_tpu_info().vmem_capacity_bytes)
    except Exception:
        pass
    budget = max(16 * 1024 * 1024, (cap * 3) // 4)
    return int(min(budget, max(16 * 1024 * 1024, 2 * int(need_bytes))))


def _resident_spec(block_shape, index_map):
    """Single-buffered BlockSpec for operands whose index_map is constant
    (weights / bias) -- avoids allocating a useless second pipeline buffer."""
    try:
        return pl.BlockSpec(block_shape, index_map, pipeline_mode=pl.Buffered(1))
    except (TypeError, AttributeError):
        return pl.BlockSpec(block_shape, index_map)


# ---------------------------------------------------------------------------
# Generic tiled matmul + bias:  out = x @ w + b
#   grid = (M tiles  [parallel],  K tiles  [arbitrary, reduction last])
#   f32 accumulator scratch, init at k==0, bias+writeback at last k.
# Used for (1) the hoisted LSTM input projection and (2) the final fc.
# ---------------------------------------------------------------------------
def _matmul_bias_kernel(x_ref, w_ref, b_ref, o_ref, acc_ref):
    k = pl.program_id(1)

    @pl.when(k == 0)
    def _init():
        acc_ref[...] = jnp.zeros_like(acc_ref)

    acc_ref[...] += jnp.dot(x_ref[...], w_ref[...],
                            preferred_element_type=jnp.float32)

    @pl.when(k == pl.num_programs(1) - 1)
    def _finalize():
        o_ref[...] = (acc_ref[...] + b_ref[...]).astype(o_ref.dtype)


def _matmul_bias(x2d, w, b, *, out_dtype=None, tm_cap=256, tk_cap=512,
                 matmul_dtype=jnp.bfloat16):
    """x2d: (M, K); w: (K, OUT); b: (1, OUT).  Returns (M, OUT) in out_dtype."""
    M, K = x2d.shape
    OUT = w.shape[1]
    out_dtype = out_dtype or x2d.dtype
    b = b.reshape(1, -1)

    # Lane-dense output (unmasked vst): pad OUT up to a multiple of 128.
    OUT_pad = _round_up(OUT, 128)
    if OUT_pad != OUT:
        w = jnp.pad(w, ((0, 0), (0, OUT_pad - OUT)))
        b = jnp.pad(b, ((0, 0), (0, OUT_pad - OUT)))

    # K tile: lane-aligned; single block when small, else stream tk_cap chunks.
    K128 = _round_up(K, 128)
    tk = K128 if K128 <= tk_cap else tk_cap
    K_pad = _round_up(K, tk)
    # M tile: multiple of 8, capped so large batches pipeline / megacore-shard.
    tm = min(_round_up(M, 8), tm_cap)
    M_pad = _round_up(M, tm)

    if (M_pad, K_pad) != (M, K):
        x2d = jnp.pad(x2d, ((0, M_pad - M), (0, K_pad - K)))
    if K_pad != K:
        w = jnp.pad(w, ((0, K_pad - K), (0, 0)))

    # bf16 MXU operands, f32 accumulation; bias stays f32.
    x2d = x2d.astype(matmul_dtype)
    w = w.astype(matmul_dtype)
    b = b.astype(jnp.float32)

    n_m, n_k = M_pad // tm, K_pad // tk
    itm = jnp.dtype(matmul_dtype).itemsize
    need = (2 * tm * tk * itm                      # x tiles (double-buffered)
            + 2 * tk * OUT_pad * itm               # w tiles (double-buffered)
            + OUT_pad * 4                          # bias (resident)
            + 2 * tm * OUT_pad * jnp.dtype(out_dtype).itemsize   # out tiles
            + tm * OUT_pad * 4)                    # accumulator scratch

    out = pl.pallas_call(
        _matmul_bias_kernel,
        out_shape=jax.ShapeDtypeStruct((M_pad, OUT_pad), out_dtype),
        grid_spec=pltpu.PrefetchScalarGridSpec(
            num_scalar_prefetch=0,
            grid=(n_m, n_k),
            in_specs=[
                pl.BlockSpec((tm, tk), lambda i, k: (i, k)),
                pl.BlockSpec((tk, OUT_pad), lambda i, k: (k, 0)),
                _resident_spec((1, OUT_pad), lambda i, k: (0, 0)),
            ],
            out_specs=pl.BlockSpec((tm, OUT_pad), lambda i, k: (i, 0)),
            scratch_shapes=[pltpu.VMEM((tm, OUT_pad), jnp.float32)],
        ),
        compiler_params=pltpu.CompilerParams(
            dimension_semantics=("parallel", "arbitrary"),
            vmem_limit_bytes=_vmem_limit_bytes(need),
        ),
    )(x2d, w, b)
    return out[:M, :OUT]


# ---------------------------------------------------------------------------
# LSTM recurrence over precomputed input gates.
#   gates_x : (T, F, 4H) = x @ W_ih + (b_ih + b_hh), precomputed above.
#   grid = (F chunks [parallel -> v7x 2nd TC], time blocks [arbitrary]);
#   inner fori_loop(unroll=True) runs the steps of one time block; h/c live in
#   VMEM scratch and persist across grid steps (re-zeroed at each t-block 0).
# ---------------------------------------------------------------------------
def _lstm_recurrence_kernel(gx_ref, whh_ref, out_ref, h_ref, c_ref, *,
                            matmul_dtype):
    tb = pl.program_id(1)          # time-block index (innermost grid axis)

    @pl.when(tb == 0)
    def _init():
        h_ref[...] = jnp.zeros_like(h_ref)
        c_ref[...] = jnp.zeros_like(c_ref)

    t_blk = gx_ref.shape[0]
    H = h_ref.shape[-1]
    w_hh = whh_ref[...]            # resident (H, 4H), bf16

    # NOTE: for very large F (>=128) chunk the rows here to limit vreg
    # pressure; at module shapes (F <= ~100) the (F, 4H) f32 gates fit.
    def step(s, carry):
        h, c = carry
        # PyTorch gate order along 4H: i, f, g, o.  Bias already folded in gx.
        gates = gx_ref[s] + jnp.dot(h.astype(matmul_dtype), w_hh,
                                    preferred_element_type=jnp.float32)
        i = jax.nn.sigmoid(gates[:, 0 * H:1 * H])
        f = jax.nn.sigmoid(gates[:, 1 * H:2 * H])
        g = jnp.tanh(gates[:, 2 * H:3 * H])
        o = jax.nn.sigmoid(gates[:, 3 * H:4 * H])
        c = f * c + i * g
        h = o * jnp.tanh(c)
        out_ref[s] = h.astype(out_ref.dtype)
        return (h, c)

    h, c = lax.fori_loop(0, t_blk, step, (h_ref[...], c_ref[...]), unroll=True)
    h_ref[...] = h
    c_ref[...] = c


def _lstm_recurrence(gates_x, w_hh, *, t_blk=8, matmul_dtype=jnp.bfloat16,
                     out_dtype=jnp.float32):
    """gates_x: (T, F, 4H) f32; w_hh: (H, 4H).  Returns (T, F, H)."""
    T, F, H4 = gates_x.shape
    H = H4 // 4

    # Sublane-align F; pad T to a multiple of the time block (padded rows see
    # zero gates -> harmless, sliced off below).
    F_pad = _round_up(F, 8)
    t_blk = max(1, min(t_blk, T))
    T_pad = _round_up(T, t_blk)
    if (T_pad, F_pad) != (T, F):
        gates_x = jnp.pad(gates_x, ((0, T_pad - T), (0, F_pad - F), (0, 0)))

    # v7x: split the independent F (batch) rows across the 2 TensorCores when
    # each chunk stays a multiple of 8; no-op on single-TC v5e/v6e.
    n_f = 2 if (F_pad % 16 == 0) else 1
    F_chunk = F_pad // n_f
    n_t = T_pad // t_blk

    w_hh = w_hh.astype(matmul_dtype)

    need = (2 * t_blk * F_chunk * H4 * 4                              # gx tiles
            + 2 * t_blk * F_chunk * H * jnp.dtype(out_dtype).itemsize  # out
            + H * H4 * jnp.dtype(matmul_dtype).itemsize                # W_hh
            + 2 * F_chunk * H * 4)                                     # h/c

    out = pl.pallas_call(
        functools.partial(_lstm_recurrence_kernel, matmul_dtype=matmul_dtype),
        out_shape=jax.ShapeDtypeStruct((T_pad, F_pad, H), out_dtype),
        grid_spec=pltpu.PrefetchScalarGridSpec(
            num_scalar_prefetch=0,
            grid=(n_f, n_t),
            in_specs=[
                pl.BlockSpec((t_blk, F_chunk, H4), lambda f, t: (t, f, 0)),
                _resident_spec((H, H4), lambda f, t: (0, 0)),
            ],
            out_specs=pl.BlockSpec((t_blk, F_chunk, H), lambda f, t: (t, f, 0)),
            scratch_shapes=[
                pltpu.VMEM((F_chunk, H), jnp.float32),   # h state
                pltpu.VMEM((F_chunk, H), jnp.float32),   # c state
            ],
        ),
        compiler_params=pltpu.CompilerParams(
            dimension_semantics=("parallel", "arbitrary"),
            vmem_limit_bytes=_vmem_limit_bytes(need),
        ),
    )(gates_x, w_hh)
    return out[:T, :F, :]


# ---------------------------------------------------------------------------
# Full module forward: LSTM -> flatten -> Linear
# ---------------------------------------------------------------------------
def lstm_model_forward(x, params, *, matmul_dtype=jnp.bfloat16):
    """x: (T, F, E) with dim0 the nn.LSTM recurrence axis (seq-first layout)."""
    T, F, E = x.shape
    H = params["w_hh"].shape[0]

    # 1) Input projection hoisted out of the recurrence: one MXU-dense,
    #    parallel-grid matmul over all T*F rows, bias folded in.
    gates_x = _matmul_bias(x.reshape(T * F, E), params["w_ih"], params["b"],
                           out_dtype=jnp.float32, tk_cap=1024,
                           matmul_dtype=matmul_dtype)
    gates_x = gates_x.reshape(T, F, 4 * H)

    # 2) Sequential recurrence: only the small h @ W_hh matmul per step.
    hs = _lstm_recurrence(gates_x, params["w_hh"], matmul_dtype=matmul_dtype,
                          out_dtype=x.dtype)

    # 3) Flatten (== x.view(x.shape[0], -1)) and fc.
    flat = hs.reshape(T, F * H)
    return _matmul_bias(flat, params["w_fc"], params["b_fc"],
                        out_dtype=x.dtype, matmul_dtype=matmul_dtype)


def init_params(key, input_emb_size, hidden, no_of_frames, out_features=64):
    """PyTorch-like uniform init; LSTM weights stored pre-transposed (in, 4H)."""
    ks = jax.random.split(key, 6)
    k_lstm = 1.0 / jnp.sqrt(hidden)
    w_ih = jax.random.uniform(ks[0], (input_emb_size, 4 * hidden), jnp.float32,
                              -k_lstm, k_lstm)
    w_hh = jax.random.uniform(ks[1], (hidden, 4 * hidden), jnp.float32,
                              -k_lstm, k_lstm)
    b_ih = jax.random.uniform(ks[2], (1, 4 * hidden), jnp.float32, -k_lstm, k_lstm)
    b_hh = jax.random.uniform(ks[3], (1, 4 * hidden), jnp.float32, -k_lstm, k_lstm)
    fc_in = hidden * no_of_frames
    k_fc = 1.0 / jnp.sqrt(fc_in)
    w_fc = jax.random.uniform(ks[4], (fc_in, out_features), jnp.float32, -k_fc, k_fc)
    b_fc = jax.random.uniform(ks[5], (1, out_features), jnp.float32, -k_fc, k_fc)
    return {"w_ih": w_ih, "w_hh": w_hh, "b": b_ih + b_hh,
            "w_fc": w_fc, "b_fc": b_fc}


def reference_forward(x, p):
    """Pure-JAX f32 reference (lax.scan LSTM + flatten + fc), PyTorch gate order."""
    T, F, _ = x.shape
    H = p["w_hh"].shape[0]

    def step(carry, x_t):
        h, c = carry
        gates = x_t @ p["w_ih"] + h @ p["w_hh"] + p["b"][0]
        i = jax.nn.sigmoid(gates[:, :H])
        f = jax.nn.sigmoid(gates[:, H:2 * H])
        g = jnp.tanh(gates[:, 2 * H:3 * H])
        o = jax.nn.sigmoid(gates[:, 3 * H:])
        c = f * c + i * g
        h = o * jnp.tanh(c)
        return (h, c), h

    init = (jnp.zeros((F, H), jnp.float32), jnp.zeros((F, H), jnp.float32))
    _, hs = jax.lax.scan(step, init, x)
    return hs.reshape(T, F * H) @ p["w_fc"] + p["b_fc"]


if __name__ == "__main__":
    # Small shapes consistent with LSTM(input_emb_size, 128) + Linear(128*frames, 64)
    # (module defaults are emb=768, frames=100; kept small & lane-aligned here).
    input_emb_size = 128
    hidden = 128              # hardwired in the PyTorch module
    no_of_frames = 8          # LSTM batch axis (dim1 of x)
    steps = 4                 # x.shape[0]: the nn.LSTM recurrence axis
    out_features = 64

    key = jax.random.PRNGKey(0)
    kx, kp = jax.random.split(key)
    x = jax.random.normal(kx, (steps, no_of_frames, input_emb_size), jnp.float32)
    params = init_params(kp, input_emb_size, hidden, no_of_frames, out_features)

    out = lstm_model_forward(x, params)
    out = jax.block_until_ready(out)

    ref = reference_forward(x, params)
    assert out.shape == (steps, out_features), out.shape
    err = float(jnp.max(jnp.abs(out - ref)))
    # bf16 MXU operands (f32 accumulation) -> tolerance looser than exact-f32.
    assert jnp.allclose(out, ref, atol=2e-2, rtol=2e-2), f"max abs err {err}"

    print("KERNEL_OK")
</pallas_src>

<mosaic_0001>
module attributes {stable_mosaic.version = 11 : i64} {
  func.func @_matmul_bias_kernel(%arg0: i32, %arg1: i32, %arg2: memref<32x128xbf16, #tpu.memory_space<vmem>>, %arg3: memref<128x512xbf16, #tpu.memory_space<vmem>>, %arg4: memref<1x512xf32, #tpu.memory_space<vmem>>, %arg5: memref<32x512xf32, #tpu.memory_space<vmem>>, %arg6: memref<32x512xf32, #tpu.memory_space<vmem>>) attributes {dimension_semantics = [#tpu.dimension_semantics<parallel>, #tpu.dimension_semantics<arbitrary>], iteration_bounds = array<i64: 1, 1>, scalar_prefetch = 0 : i64, scratch_operands = 1 : i64, tpu.core_type = #tpu.core_type<tc>, window_params = [{transform_indices = @transform_0, window_bounds = array<i64: 32, 128>}, {transform_indices = @transform_1, window_bounds = array<i64: 128, 512>}, {pipeline_mode = #tpu.pipeline_mode<synchronous>, transform_indices = @transform_2, window_bounds = array<i64: 1, 512>}, {transform_indices = @transform_3, window_bounds = array<i64: 32, 512>}]} {
    %c0_i32 = arith.constant 0 : i32
    %0 = arith.cmpi eq, %arg1, %c0_i32 : i32
    %1 = arith.extui %0 : i1 to i32
    %c0_i32_0 = arith.constant 0 : i32
    %2 = arith.cmpi ne, %1, %c0_i32_0 : i32
    scf.if %2 {
      %cst_10 = arith.constant 0.000000e+00 : f32
      %12 = vector.broadcast %cst_10 : f32 to vector<32x512xf32>
      %c0_11 = arith.constant 0 : index
      %c0_12 = arith.constant 0 : index
      %13 = vector.load %arg6[%c0_11, %c0_12] : memref<32x512xf32, #tpu.memory_space<vmem>>, vector<32x512xf32>
      tpu.vector_store %arg6[%c0_11, %c0_12], %12 {strides = array<i32>} : memref<32x512xf32, #tpu.memory_space<vmem>>, vector<32x512xf32>,
    } else {
    }
    %c0 = arith.constant 0 : index
    %c0_1 = arith.constant 0 : index
    %3 = vector.load %arg6[%c0, %c0_1] : memref<32x512xf32, #tpu.memory_space<vmem>>, vector<32x512xf32>
    %c0_2 = arith.constant 0 : index
    %c0_3 = arith.constant 0 : index
    %4 = vector.load %arg2[%c0_2, %c0_3] : memref<32x128xbf16, #tpu.memory_space<vmem>>, vector<32x128xbf16>
    %c0_4 = arith.constant 0 : index
    %c0_5 = arith.constant 0 : index
    %5 = vector.load %arg3[%c0_4, %c0_5] : memref<128x512xbf16, #tpu.memory_space<vmem>>, vector<128x512xbf16>
    %cst = arith.constant dense<0.000000e+00> : vector<32x512xf32>
    %6 = tpu.matmul %4, %5, %cst {dimension_numbers = #tpu.dot_dimension_numbers<[1], [0], [0], [1], [0, 0, 1, 1], [], []>} : vector<32x128xbf16>, vector<128x512xbf16>, vector<32x512xf32> -> vector<32x512xf32>
    %7 = arith.addf %3, %6 : vector<32x512xf32>
    %c0_6 = arith.constant 0 : index
    %c0_7 = arith.constant 0 : index
    %8 = vector.load %arg6[%c0_6, %c0_7] : memref<32x512xf32, #tpu.memory_space<vmem>>, vector<32x512xf32>
    tpu.vector_store %arg6[%c0_6, %c0_7], %7 {strides = array<i32>} : memref<32x512xf32, #tpu.memory_space<vmem>>, vector<32x512xf32>,
    %c0_i32_8 = arith.constant 0 : i32
    %9 = arith.cmpi eq, %arg1, %c0_i32_8 : i32
    %10 = arith.extui %9 : i1 to i32
    %c0_i32_9 = arith.constant 0 : i32
    %11 = arith.cmpi ne, %10, %c0_i32_9 : i32
    scf.if %11 {
      %c0_10 = arith.constant 0 : index
      %c0_11 = arith.constant 0 : index
      %12 = vector.load %arg6[%c0_10, %c0_11] : memref<32x512xf32, #tpu.memory_space<vmem>>, vector<32x512xf32>
      %c0_12 = arith.constant 0 : index
      %c0_13 = arith.constant 0 : index
      %13 = vector.load %arg4[%c0_12, %c0_13] : memref<1x512xf32, #tpu.memory_space<vmem>>, vector<1x512xf32>
      %14 = vector.broadcast %13 : vector<1x512xf32> to vector<32x512xf32>
      %15 = arith.addf %12, %14 : vector<32x512xf32>
      %c0_14 = arith.constant 0 : index
      %c0_15 = arith.constant 0 : index
      %16 = vector.load %arg5[%c0_14, %c0_15] : memref<32x512xf32, #tpu.memory_space<vmem>>, vector<32x512xf32>
      tpu.vector_store %arg5[%c0_14, %c0_15], %15 {strides = array<i32>} : memref<32x512xf32, #tpu.memory_space<vmem>>, vector<32x512xf32>,
    } else {
    }
    return
  }
  func.func @transform_0(%arg0: i32, %arg1: i32) -> (i32, i32) {
    %c0_i32 = arith.constant 0 : i32
    return %arg0, %arg1 : i32, i32
  }
  func.func @transform_1(%arg0: i32, %arg1: i32) -> (i32, i32) {
    %c0_i32 = arith.constant 0 : i32
    %c0_i32_0 = arith.constant 0 : i32
    return %arg1, %c0_i32 : i32, i32
  }
  func.func @transform_2(%arg0: i32, %arg1: i32) -> (i32, i32) {
    %c0_i32 = arith.constant 0 : i32
    %c0_i32_0 = arith.constant 0 : i32
    %c0_i32_1 = arith.constant 0 : i32
    return %c0_i32, %c0_i32_0 : i32, i32
  }
  func.func @transform_3(%arg0: i32, %arg1: i32) -> (i32, i32) {
    %c0_i32 = arith.constant 0 : i32
    %c0_i32_0 = arith.constant 0 : i32
    return %arg0, %c0_i32 : i32, i32
  }
}

</mosaic_0001>

<bundles_post_ra>
// kernel: tpu_custom_call.1
= control target key start
LH: loop header
LB: loop body
LE: loop exit
PB: predicated region body
PF: predicated region fallthrough
CT: control target
= control target key end

     0   :  { %8 = vsyncpa [#allocation4], 0  ;;  %s756_s0 = inlined_call_operand.hbm [shape: bf16[32,128], index: 0, kind: input, shape index: {}]   ;;  %s757_s1 = inlined_call_operand.hbm [shape: bf16[128,512], index: 1, kind: input, shape index: {}]   ;;  %s758_s2 = inlined_call_operand.hbm [shape: f32[1,512], index: 2, kind: input, shape index: {}]   ;;  %s759_s3 = inlined_call_operand.hbm [shape: f32[32,512], index: 3, kind: output, shape index: {}]  }
   0x1   :  { %9 = vsyncpa [#allocation7], 0 }
   0x2   :  { %10 = vsyncpa [#allocation5], 0  ;;  %s709_s12 = smov [#allocation6]  }
   0x3   :  { %s28_s13 = sshll.u32 %s709_s12, 4  ;;  %s29_s13 = int_to_ptr.vmem [resolvable:$true] %s28_s13 }
   0x4   :  { %s631_s14 = scalar_lea.vmem %s29_s13, 4096  ;;  %p636_p1 = scmp.lt.s32.totalorder %s29_s13, %s29_s13 }
   0x5   :  { %p632_p0 = scmp.ne.s32.totalorder %s29_s13, %s631_s14  ;;  %p637_p2 = scmp.lt.s32.totalorder %s631_s14, %s631_s14 }
   0x7   :  { %p638_p3 = por %p637_p2, %p636_p1 }
   0x9   :  { %p639_p4 = pnand %p638_p3, %p632_p0 }
   0xb   :  { %642 = shalt.err (!%p639_p4)
}
   0xc   :  { %s710_s15 = smov 256   ;;  %s711_s16 = smov 16  }
   0xd   :  { %34 = dma.hbm_to_vmem [thread:$0]  %s757_s1, 4096, %s29_s13, [#allocation7], %s710_s15, %s710_s15, %s711_s16  }
   0xe   :  { %s712_s19 = smov [#allocation3]  }
   0xf   :  { %s16_s20 = sshll.u32 %s712_s19, 4  ;;  %s17_s20 = int_to_ptr.vmem [resolvable:$true] %s16_s20 }
  0x10   :  { %s651_s21 = scalar_lea.vmem %s17_s20, 256  ;;  %p656_p6 = scmp.lt.s32.totalorder %s17_s20, %s17_s20 }
  0x11   :  { %p652_p5 = scmp.ne.s32.totalorder %s17_s20, %s651_s21  ;;  %p657_p7 = scmp.lt.s32.totalorder %s651_s21, %s651_s21 }
  0x13   :  { %p658_p8 = por %p657_p7, %p656_p6 }
  0x15   :  { %p659_p9 = pnand %p658_p8, %p652_p5 }
  0x17   :  { %662 = shalt.err (!%p659_p9)
}
  0x18   :  { %s713_s22 = smov 64   ;;  %s714_s23 = smov 4  }
  0x19   :  { %22 = dma.hbm_to_vmem [thread:$0]  %s756_s0, 256, %s17_s20, [#allocation4], %s713_s22, %s713_s22, %s714_s23  }
  0x1a   :  { %s715_s26 = smov [#allocation8]  }
  0x1b   :  { %s41_s27 = sshll.u32 %s715_s26, 4  ;;  %s42_s27 = int_to_ptr.vmem [resolvable:$true] %s41_s27 }
  0x1c   :  { %s671_s1 = scalar_lea.vmem %s42_s27, 64  ;;  %p676_p11 = scmp.lt.s32.totalorder %s42_s27, %s42_s27 }
  0x1d   :  { %p672_p10 = scmp.ne.s32.totalorder %s42_s27, %s671_s1  ;;  %p677_p12 = scmp.lt.s32.totalorder %s671_s1, %s671_s1 }
  0x1f   :  { %p678_p13 = por %p677_p12, %p676_p11 }
  0x21   :  { %p679_p0 = pnand %p678_p13, %p672_p10 }
  0x23   :  { %682 = shalt.err (!%p679_p0)
}
  0x24   :  { %44 = dma.hbm_to_vmem [thread:$0]  %s758_s2, 64, %s42_s27, [#allocation7]  }
  0x25   :  { %703 = dma.done.wait [#allocation4], 256  }
  0x26   :  { %704 = vsyncadd [#allocation4], 4294967040 }
  0x27   :  { %705 = dma.done.wait [#allocation7], 4160  }
  0x28   :  { %706 = vsyncadd [#allocation7], 4294963136  ;;  %v716_v0 = vmov 0   ;;  %v573_v1 = vld [vmem:[#allocation6 + $0xe4] ss:$16 sps:$4 sm:$0xff]   ;;  %v622_v34 = vld [vmem:[#allocation3 + $0x8] sm:$0xff]   ;;  %v458_v35 = vlaneseq }
  0x29   :  { %331 = vmatprep.mubr.bf16.mxu0 %v716_v0  ;;  %384 = vmatprep.mubr.bf16.mxu1 %v716_v0  ;;  %v575_v2 = vld [vmem:[#allocation6 + $0xec] ss:$16 sps:$4 sm:$0xff]   ;;  %v577_v3 = vld [vmem:[#allocation6 + $0xe0] ss:$16 sps:$4 sm:$0xff]   ;;  %v578_v4 = vld [vmem:[#allocation6 + $0xe8] ss:$16 sps:$4 sm:$0xff]  }
  0x2a   :  { %299 = vmatprep.subr.bf16.mxu0 %v573_v1  ;;  %352 = vmatprep.subr.bf16.mxu1 %v575_v2  ;;  %v579_v5 = vld [vmem:[#allocation6 + $0xc4] ss:$16 sps:$4 sm:$0xff]   ;;  %v581_v6 = vld [vmem:[#allocation6 + $0xcc] ss:$16 sps:$4 sm:$0xff]   ;;  %v583_v7 = vld [vmem:[#allocation6 + $0xc0] ss:$16 sps:$4 sm:$0xff]  }
  0x2b   :  { %300 = vmatpush1.bf16.msra.mxu0 %v577_v3  ;;  %353 = vmatpush1.bf16.msra.mxu1 %v578_v4  ;;  %v584_v8 = vld [vmem:[#allocation6 + $0xc8] ss:$16 sps:$4 sm:$0xff]   ;;  %v585_v9 = vld [vmem:[#allocation6 + $0xa4] ss:$16 sps:$4 sm:$0xff]   ;;  %v587_v10 = vld [vmem:[#allocation6 + $0xac] ss:$16 sps:$4 sm:$0xff]  }
  0x2c   :  { %301 = vmatprep.subr.bf16.mxu0 %v579_v5  ;;  %354 = vmatprep.subr.bf16.mxu1 %v581_v6  ;;  %v589_v11 = vld [vmem:[#allocation6 + $0xa0] ss:$16 sps:$4 sm:$0xff]   ;;  %v590_v12 = vld [vmem:[#allocation6 + $0xa8] ss:$16 sps:$4 sm:$0xff]   ;;  %v591_v13 = vld [vmem:[#allocation6 + $0x84] ss:$16 sps:$4 sm:$0xff]  }
  0x2d   :  { %v593_v14 = vld [vmem:[#allocation6 + $0x8c] ss:$16 sps:$4 sm:$0xff]   ;;  %v595_v15 = vld [vmem:[#allocation6 + $0x80] ss:$16 sps:$4 sm:$0xff]   ;;  %v596_v16 = vld [vmem:[#allocation6 + $0x88] ss:$16 sps:$4 sm:$0xff]  }
  0x2e   :  { %v597_v17 = vld [vmem:[#allocation6 + $0x64] ss:$16 sps:$4 sm:$0xff]   ;;  %v599_v18 = vld [vmem:[#allocation6 + $0x6c] ss:$16 sps:$4 sm:$0xff]   ;;  %v601_v19 = vld [vmem:[#allocation6 + $0x60] ss:$16 sps:$4 sm:$0xff]  }
  0x2f   :  { %302 = vmatpush1.bf16.msra.mxu0 %v583_v7  ;;  %355 = vmatpush1.bf16.msra.mxu1 %v584_v8  ;;  %v602_v20 = vld [vmem:[#allocation6 + $0x68] ss:$16 sps:$4 sm:$0xff]   ;;  %v603_v21 = vld [vmem:[#allocation6 + $0x44] ss:$16 sps:$4 sm:$0xff]   ;;  %v605_v22 = vld [vmem:[#allocation6 + $0x4c] ss:$16 sps:$4 sm:$0xff]  }
  0x30   :  { %303 = vmatprep.subr.bf16.mxu0 %v585_v9  ;;  %356 = vmatprep.subr.bf16.mxu1 %v587_v10  ;;  %v607_v23 = vld [vmem:[#allocation6 + $0x40] ss:$16 sps:$4 sm:$0xff]   ;;  %v608_v24 = vld [vmem:[#allocation6 + $0x48] ss:$16 sps:$4 sm:$0xff]   ;;  %v609_v25 = vld [vmem:[#allocation6 + $0x24] ss:$16 sps:$4 sm:$0xff]  }
  0x31   :  { %v611_v26 = vld [vmem:[#allocation6 + $0x2c] ss:$16 sps:$4 sm:$0xff]   ;;  %v613_v27 = vld [vmem:[#allocation6 + $0x20] ss:$16 sps:$4 sm:$0xff]   ;;  %v614_v28 = vld [vmem:[#allocation6 + $0x28] ss:$16 sps:$4 sm:$0xff]  }
  0x32   :  { %v615_v29 = vld [vmem:[#allocation6 + $0x4] ss:$16 sps:$4 sm:$0xff]   ;;  %v617_v30 = vld [vmem:[#allocation6 + $0xc] ss:$16 sps:$4 sm:$0xff]   ;;  %v619_v31 = vld [vmem:[#allocation6] ss:$16 sps:$4 sm:$0xff]  }
  0x33   :  { %304 = vmatpush1.bf16.msra.mxu0 %v589_v11  ;;  %357 = vmatpush1.bf16.msra.mxu1 %v590_v12  ;;  %v620_v32 = vld [vmem:[#allocation6 + $0x8] ss:$16 sps:$4 sm:$0xff]   ;;  %v621_v33 = vld [vmem:[#allocation3] sm:$0xff]   ;;  %v459_v36 = vshrl.u32 %v458_v35, 7  ;;  %v456_v39 = vld [vmem:[#allocation8] sm:$0xf] }
  0x34   :  { %305 = vmatprep.subr.bf16.mxu0 %v591_v13  ;;  %358 = vmatprep.subr.bf16.mxu1 %v593_v14  ;;  %s717_s0 = smov [#allocation9]  }
  0x35   :  { %v460_v37 = vsub.s32 0, %v459_v36  ;;  %v468_v38 = vsub.s32 2, %v459_v36  ;;  %v464_v40 = vsub.s32 1, %v459_v36  ;;  %v472_v41 = vsub.s32 3, %v459_v36  ;;  %s515_s2 = sshll.u32 %s717_s0, 4  ;;  %s516_s2 = int_to_ptr.vmem [resolvable:$true] %s515_s2 }
  0x36   :  { %s683_s30 = scalar_lea.vmem %s516_s2, 2048  ;;  %p688_p2 = scmp.lt.s32.totalorder %s516_s2, %s516_s2 }
  0x37   :  { %306 = vmatpush1.bf16.msra.mxu0 %v595_v15  ;;  %359 = vmatpush1.bf16.msra.mxu1 %v596_v16  ;;  %v461_v42 = vrot.slane %v456_v39, %v460_v37  ;;  %v469_v43 = vrot.slane %v456_v39, %v468_v38  ;;  %v465_v44 = vrot.slane %v456_v39, %v464_v40  ;;  %p684_p1 = scmp.ne.s32.totalorder %s516_s2, %s683_s30  ;;  %p689_p3 = scmp.lt.s32.totalorder %s683_s30, %s683_s30 }
  0x38   :  { %307 = vmatprep.subr.bf16.mxu0 %v597_v17  ;;  %360 = vmatprep.subr.bf16.mxu1 %v599_v18  ;;  %v473_v45 = vrot.slane %v456_v39, %v472_v41 }
  0x39   :  { %p690_p4 = por %p689_p3, %p688_p2 }
  0x3b   :  { %308 = vmatpush1.bf16.msra.mxu0 %v601_v19  ;;  %361 = vmatpush1.bf16.msra.mxu1 %v602_v20  ;;  %p691_p5 = pnand %p690_p4, %p684_p1 }
  0x3c   :  { %309 = vmatprep.subr.bf16.mxu0 %v603_v21  ;;  %362 = vmatprep.subr.bf16.mxu1 %v605_v22 }
  0x3f   :  { %310 = vmatpush1.bf16.msra.mxu0 %v607_v23  ;;  %363 = vmatpush1.bf16.msra.mxu1 %v608_v24 }
  0x40   :  { %311 = vmatprep.subr.bf16.mxu0 %v609_v25  ;;  %364 = vmatprep.subr.bf16.mxu1 %v611_v26 }
  0x43   :  { %312 = vmatpush1.bf16.msra.mxu0 %v613_v27  ;;  %365 = vmatpush1.bf16.msra.mxu1 %v614_v28 }
  0x44   :  { %313 = vmatprep.subr.bf16.mxu0 %v615_v29  ;;  %366 = vmatprep.subr.bf16.mxu1 %v617_v30 }
  0x47   :  { %314 = vmatpush1.bf16.msra.mxu0 %v619_v31  ;;  %367 = vmatpush1.bf16.msra.mxu1 %v620_v32 }
  0x4a   :  { %332 = vmatmul.mubr.bf16.vlgmr.msra.gmra.mxu0 %v621_v33  ;;  %385 = vmatmul.mubr.bf16.vlgmr.msra.gmra.mxu1 %v621_v33 }
  0x4b   :  { %341 = vmatprep.mubr.bf16.mxu0 %v716_v0  ;;  %394 = vmatprep.mubr.bf16.mxu1 %v716_v0 }
  0x52   :  { %342 = vmatmul.mubr.bf16.gmra.mxu0 %v622_v34  ;;  %395 = vmatmul.mubr.bf16.gmra.mxu1 %v622_v34 }
 0x10a   :  { %v333_v46 = vpop.f32.mrf.mxu0  ;;  %v386_v47 = vpop.f32.mrf.mxu1 }
 0x10b   :  { %v478_v48 = vadd.f32 %v461_v42, %v333_v46  ;;  %v480_v49 = vadd.f32 %v469_v43, %v386_v47 }
 0x10c   :  { %v335_v50 = vpop.f32.mrf.mxu0  ;;  %v388_v51 = vpop.f32.mrf.mxu1 }
 0x10d   :  { %494 = vst [vmem:[#allocation9] sm:$0xff] %v478_v48  ;;  %496 = vst [vmem:[#allocation9 + $0x10] sm:$0xff] %v480_v49  ;;  %v479_v52 = vadd.f32 %v465_v44, %v335_v50  ;;  %v481_v53 = vadd.f32 %v473_v45, %v388_v51 }
 0x10e   :  { %v337_v54 = vpop.f32.mrf.mxu0  ;;  %v390_v55 = vpop.f32.mrf.mxu1 }
 0x10f   :  { %495 = vst [vmem:[#allocation9 + $0x8] sm:$0xff] %v479_v52  ;;  %497 = vst [vmem:[#allocation9 + $0x18] sm:$0xff] %v481_v53  ;;  %v482_v56 = vadd.f32 %v461_v42, %v337_v54  ;;  %v484_v57 = vadd.f32 %v469_v43, %v390_v55 }
 0x110   :  { %v339_v58 = vpop.f32.mrf.mxu0  ;;  %v392_v59 = vpop.f32.mrf.mxu1 }
 0x111   :  { %498 = vst [vmem:[#allocation9 + $0x20] sm:$0xff] %v482_v56  ;;  %500 = vst [vmem:[#allocation9 + $0x30] sm:$0xff] %v484_v57  ;;  %v483_v60 = vadd.f32 %v465_v44, %v339_v58  ;;  %v485_v61 = vadd.f32 %v473_v45, %v392_v59 }
 0x112   :  { %v343_v62 = vpop.f32.mrf.mxu0  ;;  %v396_v63 = vpop.f32.mrf.mxu1 }
 0x113   :  { %499 = vst [vmem:[#allocation9 + $0x28] sm:$0xff] %v483_v60  ;;  %501 = vst [vmem:[#allocation9 + $0x38] sm:$0xff] %v485_v61  ;;  %v486_v0 = vadd.f32 %v461_v42, %v343_v62  ;;  %v488_v1 = vadd.f32 %v469_v43, %v396_v63 }
 0x114   :  { %v345_v2 = vpop.f32.mrf.mxu0  ;;  %v398_v3 = vpop.f32.mrf.mxu1 }
 0x115   :  { %502 = vst [vmem:[#allocation9 + $0x40] sm:$0xff] %v486_v0  ;;  %504 = vst [vmem:[#allocation9 + $0x50] sm:$0xff] %v488_v1  ;;  %v487_v4 = vadd.f32 %v465_v44, %v345_v2  ;;  %v489_v5 = vadd.f32 %v473_v45, %v398_v3 }
 0x116   :  { %v347_v6 = vpop.f32.mrf.mxu0  ;;  %v400_v7 = vpop.f32.mrf.mxu1 }
 0x117   :  { %503 = vst [vmem:[#allocation9 + $0x48] sm:$0xff] %v487_v4  ;;  %505 = vst [vmem:[#allocation9 + $0x58] sm:$0xff] %v489_v5  ;;  %v490_v8 = vadd.f32 %v461_v42, %v347_v6  ;;  %v492_v9 = vadd.f32 %v469_v43, %v400_v7 }
 0x118   :  { %v349_v10 = vpop.f32.mrf.mxu0  ;;  %v402_v11 = vpop.f32.mrf.mxu1 }
 0x119   :  { %506 = vst [vmem:[#allocation9 + $0x60] sm:$0xff] %v490_v8  ;;  %508 = vst [vmem:[#allocation9 + $0x70] sm:$0xff] %v492_v9  ;;  %v491_v12 = vadd.f32 %v465_v44, %v349_v10  ;;  %v493_v13 = vadd.f32 %v473_v45, %v402_v11 }
 0x11b   :  { %507 = vst [vmem:[#allocation9 + $0x68] sm:$0xff] %v491_v12  ;;  %509 = vst [vmem:[#allocation9 + $0x78] sm:$0xff] %v493_v13 }
 0x11c   :  { %694 = shalt.err (!%p691_p5)
}
 0x11d   :  { %s718_s4 = smov 512   ;;  %s719_s5 = smov 32  }
 0x11e   :  { %521 = dma.vmem_to_hbm [thread:$0]  %s516_s2, 2048, %s759_s3, [#allocation5], %s718_s4, %s718_s4, %s719_s5  }
 0x11f   :  { %707 = dma.done.wait [#allocation5], 2048  }
 0x120   :  { %708 = vsyncadd [#allocation5], 4294965248 }
 0x121   :  { %525 = vsyncpa [#allocation4], 1 }
 0x122   :  { %526 = vsyncpa [#allocation7], 1 }
 0x123   :  { %527 = vsyncpa [#allocation5], 1 }

</bundles_post_ra>
